<compile_context>
chip_gen: v6e
topology: v6e:2x2x1
jax: 0.10.0
libtpu: 0.0.40
codegen_flags: <defaults>
</compile_context>

<pallas_src>
import jax
import jax.numpy as jnp
from jax.experimental import pallas as pl
from jax.experimental.pallas import tpu as pltpu


INPUT_DIM = 2
HIDDEN_DIMS = (32, 64)
OUTPUT_DIM = 64

_GROUP = 2          # original rows packed per grouped row (2 * 64 = 128 lanes out)
_MAX_TMG = 4096     # grouped rows per grid step (= 8192 original rows)


def _round_up(v, m):
    return (v + m - 1) // m * m


def _pick_tmg(n_grp):
    """Grouped-row tile: as large as the VMEM budget allows.  When more than
    one grid step is needed, force an even step count so the 'parallel' grid
    axis splits evenly over v7x's two TensorCores (no idle core / tiny tail)."""
    steps = max(1, pl.cdiv(n_grp, _MAX_TMG))
    if steps > 1 and steps % 2:
        steps += 1
    tmg = pl.cdiv(n_grp, steps)
    return max(8, _round_up(tmg, 8))


def _mlp_head_kernel(x_ref, w1_ref, b1_ref, w2_ref, b2_ref, w3_ref, b3_ref,
                     o_ref):
    """Fused 3-layer MLP + ReLU on one (tmg, 2*input_dim) grouped-row tile."""
    x = x_ref[...]                        # (tmg, 2*input_dim)
    k_dim = x.shape[1]
    w1 = w1_ref[...]

    if k_dim <= 8:
        # K is tiny (4): broadcast-FMA on the VPU instead of a near-empty
        # MXU matmul (K=4/256 utilization + full push/pop latency).
        acc = x[:, 0:1] * w1[0:1, :]
        for k in range(1, k_dim):
            acc = acc + x[:, k:k + 1] * w1[k:k + 1, :]
    else:
        acc = jnp.dot(x, w1, preferred_element_type=jnp.float32)
    h1 = jnp.maximum(acc + b1_ref[...], 0.0)

    h2 = jnp.dot(h1, w2_ref[...], preferred_element_type=jnp.float32)
    h2 = jnp.maximum(h2 + b2_ref[...], 0.0)

    h3 = jnp.dot(h2, w3_ref[...], preferred_element_type=jnp.float32)
    h3 = jnp.maximum(h3 + b3_ref[...], 0.0)

    o_ref[...] = h3.astype(o_ref.dtype)   # (tmg, 2*output_dim) = 128 lanes, dense


def _block_diag2(w):
    """2x2 block-diagonal expansion of a (K, M) weight -> (2K, 2M)."""
    z = jnp.zeros_like(w)
    top = jnp.concatenate([w, z], axis=1)
    bot = jnp.concatenate([z, w], axis=1)
    return jnp.concatenate([top, bot], axis=0)


def _group_params(params):
    grouped = []
    for w, b in params:
        wg = _block_diag2(w.astype(jnp.float32))
        bg = jnp.concatenate([b, b], axis=1).astype(jnp.float32)
        grouped.append((wg, bg))
    return grouped


@jax.jit
def mlp_head_forward(x, params):
    """Runs MLPHead.forward. x: (B, D) or (B, T, D). Returns matching shape."""
    (w1, b1), (w2, b2), (w3, b3) = params

    orig_shape = x.shape
    in_dim = orig_shape[-1]
    out_dim = w3.shape[1]

    x2d = x.reshape(-1, in_dim).astype(jnp.float32)
    n = x2d.shape[0]

    # Pack rows in pairs: input (n,2)->(n_grp,4), output (n,64)->(n_grp,128).
    n_grp = -(-n // _GROUP)
    pad = _GROUP * n_grp - n
    if pad:
        x2d = jnp.pad(x2d, ((0, pad), (0, 0)))   # tiny: 8 bytes per padded row
    xg = x2d.reshape(n_grp, _GROUP * in_dim)

    (w1g, b1g), (w2g, b2g), (w3g, b3g) = _group_params(
        ((w1, b1), (w2, b2), (w3, b3)))

    tmg = _pick_tmg(n_grp)
    grid = (pl.cdiv(n_grp, tmg),)   # ragged last block is masked on store

    # Weights / biases are tiny: constant index maps keep them VMEM-resident.
    full = lambda shape: pl.BlockSpec(shape, lambda i: (0, 0))

    out = pl.pallas_call(
        _mlp_head_kernel,
        out_shape=jax.ShapeDtypeStruct((n_grp, _GROUP * out_dim), jnp.float32),
        grid_spec=pltpu.PrefetchScalarGridSpec(
            num_scalar_prefetch=0,
            grid=grid,
            in_specs=[
                pl.BlockSpec((tmg, _GROUP * in_dim), lambda i: (i, 0)),
                full(w1g.shape), full(b1g.shape),
                full(w2g.shape), full(b2g.shape),
                full(w3g.shape), full(b3g.shape),
            ],
            out_specs=pl.BlockSpec((tmg, _GROUP * out_dim), lambda i: (i, 0)),
        ),
        compiler_params=pltpu.CompilerParams(
            dimension_semantics=("parallel",),
            vmem_limit_bytes=32 * 1024 * 1024),
    )(xg, w1g, b1g, w2g, b2g, w3g, b3g)

    out = out.reshape(_GROUP * n_grp, out_dim)   # free contiguous view
    if pad:
        out = out[:n]                            # only taken for odd N
    return out.reshape(*orig_shape[:-1], out_dim)


def init_params(key, input_dim=INPUT_DIM, hidden_dims=HIDDEN_DIMS,
                output_dim=OUTPUT_DIM):
    """Deterministic init mirroring nn.Linear's U(-1/sqrt(fan_in), 1/sqrt(fan_in))."""
    dims = [input_dim, *hidden_dims, output_dim]
    params = []
    for i in range(len(dims) - 1):
        key, kw, kb = jax.random.split(key, 3)
        fan_in = dims[i]
        bound = 1.0 / jnp.sqrt(fan_in)
        w = jax.random.uniform(kw, (dims[i], dims[i + 1]), jnp.float32,
                               -bound, bound)
        b = jax.random.uniform(kb, (1, dims[i + 1]), jnp.float32,
                               -bound, bound)
        params.append((w, b))
    return tuple(params)


def _reference(x, params):
    # Matches the PyTorch module: ReLU after every Linear, including the last.
    h = x.reshape(-1, x.shape[-1]).astype(jnp.float32)
    for w, b in params:
        h = jnp.maximum(h @ w + b, 0.0)
    return h.reshape(*x.shape[:-1], params[-1][0].shape[1])


if __name__ == "__main__":
    key = jax.random.PRNGKey(0)
    kp, kx = jax.random.split(key)
    params = init_params(kp)

    # Input: (batch=2, time=8, input_dim=2), N even.
    x = jax.random.normal(kx, (2, 8, INPUT_DIM), jnp.float32)
    out = jax.block_until_ready(mlp_head_forward(x, params))
    assert out.shape == (2, 8, OUTPUT_DIM), out.shape
    assert jnp.allclose(out, _reference(x, params), atol=1e-4, rtol=1e-4)

    # (batch, input_dim) path, N smaller than a tile (single ragged block).
    x2 = jax.random.normal(kx, (2, INPUT_DIM), jnp.float32)
    out2 = jax.block_until_ready(mlp_head_forward(x2, params))
    assert out2.shape == (2, OUTPUT_DIM)
    assert jnp.allclose(out2, _reference(x2, params), atol=1e-4, rtol=1e-4)

    # Odd N (21): exercises the pad-to-even path and the tail slice.
    x3 = jax.random.normal(kx, (3, 7, INPUT_DIM), jnp.float32)
    out3 = jax.block_until_ready(mlp_head_forward(x3, params))
    assert out3.shape == (3, 7, OUTPUT_DIM)
    assert jnp.allclose(out3, _reference(x3, params), atol=1e-4, rtol=1e-4)

    print("KERNEL_OK")
</pallas_src>

<mosaic_0001>
module attributes {stable_mosaic.version = 11 : i64} {
  func.func @_mlp_head_kernel(%arg0: i32, %arg1: memref<8x4xf32, #tpu.memory_space<vmem>>, %arg2: memref<4x64xf32, #tpu.memory_space<vmem>>, %arg3: memref<1x64xf32, #tpu.memory_space<vmem>>, %arg4: memref<64x128xf32, #tpu.memory_space<vmem>>, %arg5: memref<1x128xf32, #tpu.memory_space<vmem>>, %arg6: memref<128x128xf32, #tpu.memory_space<vmem>>, %arg7: memref<1x128xf32, #tpu.memory_space<vmem>>, %arg8: memref<8x128xf32, #tpu.memory_space<vmem>>) attributes {dimension_semantics = [#tpu.dimension_semantics<parallel>], iteration_bounds = array<i64: 1>, scalar_prefetch = 0 : i64, scratch_operands = 0 : i64, tpu.core_type = #tpu.core_type<tc>, window_params = [{transform_indices = @transform_0, window_bounds = array<i64: 8, 4>}, {pipeline_mode = #tpu.pipeline_mode<synchronous>, transform_indices = @transform_1, window_bounds = array<i64: 4, 64>}, {pipeline_mode = #tpu.pipeline_mode<synchronous>, transform_indices = @transform_2, window_bounds = array<i64: 1, 64>}, {pipeline_mode = #tpu.pipeline_mode<synchronous>, transform_indices = @transform_3, window_bounds = array<i64: 64, 128>}, {pipeline_mode = #tpu.pipeline_mode<synchronous>, transform_indices = @transform_4, window_bounds = array<i64: 1, 128>}, {pipeline_mode = #tpu.pipeline_mode<synchronous>, transform_indices = @transform_5, window_bounds = array<i64: 128, 128>}, {pipeline_mode = #tpu.pipeline_mode<synchronous>, transform_indices = @transform_6, window_bounds = array<i64: 1, 128>}, {transform_indices = @transform_7, window_bounds = array<i64: 8, 128>}]} {
    %c0 = arith.constant 0 : index
    %c0_0 = arith.constant 0 : index
    %0 = vector.load %arg1[%c0, %c0_0] : memref<8x4xf32, #tpu.memory_space<vmem>>, vector<8x4xf32>
    %c0_1 = arith.constant 0 : index
    %c0_2 = arith.constant 0 : index
    %1 = vector.load %arg2[%c0_1, %c0_2] : memref<4x64xf32, #tpu.memory_space<vmem>>, vector<4x64xf32>
    %2 = vector.extract_strided_slice %0 {offsets = [0, 0], sizes = [8, 1], strides = [1, 1]} : vector<8x4xf32> to vector<8x1xf32>
    %3 = vector.extract_strided_slice %1 {offsets = [0, 0], sizes = [1, 64], strides = [1, 1]} : vector<4x64xf32> to vector<1x64xf32>
    %4 = vector.broadcast %2 : vector<8x1xf32> to vector<8x64xf32>
    %5 = vector.broadcast %3 : vector<1x64xf32> to vector<8x64xf32>
    %6 = arith.mulf %4, %5 : vector<8x64xf32>
    %7 = vector.extract_strided_slice %0 {offsets = [0, 1], sizes = [8, 1], strides = [1, 1]} : vector<8x4xf32> to vector<8x1xf32>
    %8 = vector.extract_strided_slice %1 {offsets = [1, 0], sizes = [1, 64], strides = [1, 1]} : vector<4x64xf32> to vector<1x64xf32>
    %9 = vector.broadcast %7 : vector<8x1xf32> to vector<8x64xf32>
    %10 = vector.broadcast %8 : vector<1x64xf32> to vector<8x64xf32>
    %11 = arith.mulf %9, %10 : vector<8x64xf32>
    %12 = arith.addf %6, %11 : vector<8x64xf32>
    %13 = vector.extract_strided_slice %0 {offsets = [0, 2], sizes = [8, 1], strides = [1, 1]} : vector<8x4xf32> to vector<8x1xf32>
    %14 = vector.extract_strided_slice %1 {offsets = [2, 0], sizes = [1, 64], strides = [1, 1]} : vector<4x64xf32> to vector<1x64xf32>
    %15 = vector.broadcast %13 : vector<8x1xf32> to vector<8x64xf32>
    %16 = vector.broadcast %14 : vector<1x64xf32> to vector<8x64xf32>
    %17 = arith.mulf %15, %16 : vector<8x64xf32>
    %18 = arith.addf %12, %17 : vector<8x64xf32>
    %19 = vector.extract_strided_slice %0 {offsets = [0, 3], sizes = [8, 1], strides = [1, 1]} : vector<8x4xf32> to vector<8x1xf32>
    %20 = vector.extract_strided_slice %1 {offsets = [3, 0], sizes = [1, 64], strides = [1, 1]} : vector<4x64xf32> to vector<1x64xf32>
    %21 = vector.broadcast %19 : vector<8x1xf32> to vector<8x64xf32>
    %22 = vector.broadcast %20 : vector<1x64xf32> to vector<8x64xf32>
    %23 = arith.mulf %21, %22 : vector<8x64xf32>
    %24 = arith.addf %18, %23 : vector<8x64xf32>
    %c0_3 = arith.constant 0 : index
    %c0_4 = arith.constant 0 : index
    %25 = vector.load %arg3[%c0_3, %c0_4] : memref<1x64xf32, #tpu.memory_space<vmem>>, vector<1x64xf32>
    %26 = vector.broadcast %25 : vector<1x64xf32> to vector<8x64xf32>
    %27 = arith.addf %24, %26 : vector<8x64xf32>
    %cst = arith.constant 0.000000e+00 : f32
    %28 = vector.broadcast %cst : f32 to vector<8x64xf32>
    %29 = arith.maximumf %27, %28 : vector<8x64xf32>
    %c0_5 = arith.constant 0 : index
    %c0_6 = arith.constant 0 : index
    %30 = vector.load %arg4[%c0_5, %c0_6] : memref<64x128xf32, #tpu.memory_space<vmem>>, vector<64x128xf32>
    %cst_7 = arith.constant dense<0.000000e+00> : vector<8x128xf32>
    %31 = tpu.matmul %29, %30, %cst_7 {dimension_numbers = #tpu.dot_dimension_numbers<[1], [0], [0], [1], [0, 0, 1, 1], [], []>} : vector<8x64xf32>, vector<64x128xf32>, vector<8x128xf32> -> vector<8x128xf32>
    %c0_8 = arith.constant 0 : index
    %c0_9 = arith.constant 0 : index
    %32 = vector.load %arg5[%c0_8, %c0_9] : memref<1x128xf32, #tpu.memory_space<vmem>>, vector<1x128xf32>
    %33 = vector.broadcast %32 : vector<1x128xf32> to vector<8x128xf32>
    %34 = arith.addf %31, %33 : vector<8x128xf32>
    %cst_10 = arith.constant 0.000000e+00 : f32
    %35 = vector.broadcast %cst_10 : f32 to vector<8x128xf32>
    %36 = arith.maximumf %34, %35 : vector<8x128xf32>
    %c0_11 = arith.constant 0 : index
    %c0_12 = arith.constant 0 : index
    %37 = vector.load %arg6[%c0_11, %c0_12] : memref<128x128xf32, #tpu.memory_space<vmem>>, vector<128x128xf32>
    %cst_13 = arith.constant dense<0.000000e+00> : vector<8x128xf32>
    %38 = tpu.matmul %36, %37, %cst_13 {dimension_numbers = #tpu.dot_dimension_numbers<[1], [0], [0], [1], [0, 0, 1, 1], [], []>} : vector<8x128xf32>, vector<128x128xf32>, vector<8x128xf32> -> vector<8x128xf32>
    %c0_14 = arith.constant 0 : index
    %c0_15 = arith.constant 0 : index
    %39 = vector.load %arg7[%c0_14, %c0_15] : memref<1x128xf32, #tpu.memory_space<vmem>>, vector<1x128xf32>
    %40 = vector.broadcast %39 : vector<1x128xf32> to vector<8x128xf32>
    %41 = arith.addf %38, %40 : vector<8x128xf32>
    %cst_16 = arith.constant 0.000000e+00 : f32
    %42 = vector.broadcast %cst_16 : f32 to vector<8x128xf32>
    %43 = arith.maximumf %41, %42 : vector<8x128xf32>
    %c0_17 = arith.constant 0 : index
    %c0_18 = arith.constant 0 : index
    %44 = vector.load %arg8[%c0_17, %c0_18] : memref<8x128xf32, #tpu.memory_space<vmem>>, vector<8x128xf32>
    tpu.vector_store %arg8[%c0_17, %c0_18], %43 {strides = array<i32>} : memref<8x128xf32, #tpu.memory_space<vmem>>, vector<8x128xf32>,
    return
  }
  func.func @transform_0(%arg0: i32) -> (i32, i32) {
    %c0_i32 = arith.constant 0 : i32
    %c0_i32_0 = arith.constant 0 : i32
    return %arg0, %c0_i32 : i32, i32
  }
  func.func @transform_1(%arg0: i32) -> (i32, i32) {
    %c0_i32 = arith.constant 0 : i32
    %c0_i32_0 = arith.constant 0 : i32
    %c0_i32_1 = arith.constant 0 : i32
    return %c0_i32, %c0_i32_0 : i32, i32
  }
  func.func @transform_2(%arg0: i32) -> (i32, i32) {
    %c0_i32 = arith.constant 0 : i32
    %c0_i32_0 = arith.constant 0 : i32
    %c0_i32_1 = arith.constant 0 : i32
    return %c0_i32, %c0_i32_0 : i32, i32
  }
  func.func @transform_3(%arg0: i32) -> (i32, i32) {
    %c0_i32 = arith.constant 0 : i32
    %c0_i32_0 = arith.constant 0 : i32
    %c0_i32_1 = arith.constant 0 : i32
    return %c0_i32, %c0_i32_0 : i32, i32
  }
  func.func @transform_4(%arg0: i32) -> (i32, i32) {
    %c0_i32 = arith.constant 0 : i32
    %c0_i32_0 = arith.constant 0 : i32
    %c0_i32_1 = arith.constant 0 : i32
    return %c0_i32, %c0_i32_0 : i32, i32
  }
  func.func @transform_5(%arg0: i32) -> (i32, i32) {
    %c0_i32 = arith.constant 0 : i32
    %c0_i32_0 = arith.constant 0 : i32
    %c0_i32_1 = arith.constant 0 : i32
    return %c0_i32, %c0_i32_0 : i32, i32
  }
  func.func @transform_6(%arg0: i32) -> (i32, i32) {
    %c0_i32 = arith.constant 0 : i32
    %c0_i32_0 = arith.constant 0 : i32
    %c0_i32_1 = arith.constant 0 : i32
    return %c0_i32, %c0_i32_0 : i32, i32
  }
  func.func @transform_7(%arg0: i32) -> (i32, i32) {
    %c0_i32 = arith.constant 0 : i32
    %c0_i32_0 = arith.constant 0 : i32
    return %arg0, %c0_i32 : i32, i32
  }
}

</mosaic_0001>

<bundles_post_ra>
// kernel: mlp_head_forward.1
= control target key start
LH: loop header
LB: loop body
LE: loop exit
PB: predicated region body
PF: predicated region fallthrough
CT: control target
= control target key end

     0   :  { %v361_v0 = vmov 0   ;;  %v362_v2 = vmov 2   ;;  %v363_v4 = vmov 0.0   ;;  %v364_v6 = vmov 1   ;;  %s523_s0 = inlined_call_operand.vmem [shape: f32[8,4], index: 0, kind: input, shape index: {}]   ;;  %s524_s3 = inlined_call_operand.vmem [shape: f32[64,128], index: 3, kind: input, shape index: {}]   ;;  %s525_s5 = inlined_call_operand.vmem [shape: f32[128,128], index: 5, kind: input, shape index: {}]   ;;  %s526_s1 = inlined_call_operand.vmem [shape: f32[4,64], index: 1, kind: input, shape index: {}]   ;;  %s527_s2 = inlined_call_operand.vmem [shape: f32[1,64], index: 2, kind: input, shape index: {}]   ;;  %s528_s4 = inlined_call_operand.vmem [shape: f32[1,128], index: 4, kind: input, shape index: {}]   ;;  %s529_s6 = inlined_call_operand.vmem [shape: f32[1,128], index: 6, kind: input, shape index: {}]   ;;  %s530_s7 = inlined_call_operand.vmem [shape: f32[8,128], index: 7, kind: output, shape index: {}]  }
   0x1   :  { %356 = vset.pattern.permute.xlu0 %v361_v0  ;;  %v26_v1 = vld [vmem:[%s523_s0] sm:$0xff]  ;;  %358 = vset.pattern.permute.xlu1 %v362_v2  ;;  %v84_v3 = vld [vmem:[%s524_s3 + $0x38] sm:$0xff]  ;;  %v83_v5 = vld [vmem:[%s524_s3 + $0x30] sm:$0xff]  ;;  %v365_v7 = vmov 3   ;;  %vm366_vm0 = vmmov 0   ;;  %v33_v27 = vlaneseq  ;;  %vm92_vm1 = vcmask 523264  }
   0x2   :  { %30 = vperm.xlu0 %356, %v26_v1   ;;  %49 = vperm.xlu1 %358, %v26_v1   ;;  %v82_v8 = vld [vmem:[%s524_s3 + $0x28] sm:$0xff]  ;;  %v81_v9 = vld [vmem:[%s524_s3 + $0x20] sm:$0xff]  ;;  %v80_v10 = vld [vmem:[%s524_s3 + $0x18] sm:$0xff] }
   0x3   :  { %296 = vmatprep.subr.mxu0 %v363_v4  ;;  %315 = vmatprep.subr.mxu1 %v363_v4  ;;  %v79_v11 = vld [vmem:[%s524_s3 + $0x10] sm:$0xff]  ;;  %v78_v12 = vld [vmem:[%s524_s3 + $0x8] sm:$0xff]  ;;  %v182_v13 = vld [vmem:[%s525_s5 + $0x78] sm:$0xff]  ;;  %v34_v28 = vshrl.u32 %v33_v27, 7 }
   0x4   :  { %297 = vmatpush3.msra.mxu0 %v84_v3  ;;  %312 = vmatprep.mubr.msk.f32.mxu0 %vm366_vm0, %v363_v4  ;;  %v181_v14 = vld [vmem:[%s525_s5 + $0x70] sm:$0xff]  ;;  %v77_v15 = vld [vmem:[%s524_s3] sm:$0xff]  ;;  %v180_v16 = vld [vmem:[%s525_s5 + $0x68] sm:$0xff] }
   0x5   :  { %298 = vmatprep.subr.mxu0 %v363_v4  ;;  %347 = vmatprep.mubr.msk.f32.mxu1 %vm366_vm0, %v363_v4  ;;  %v179_v17 = vld [vmem:[%s525_s5 + $0x60] sm:$0xff]  ;;  %v178_v18 = vld [vmem:[%s525_s5 + $0x58] sm:$0xff]  ;;  %v177_v19 = vld [vmem:[%s525_s5 + $0x50] sm:$0xff]  ;;  %v35_v29 = vsub.s32 0, %v34_v28  ;;  %v44_v30 = vsub.s32 1, %v34_v28  ;;  %v54_v33 = vsub.s32 2, %v34_v28 }
   0x6   :  { %357 = vset.pattern.permute.xlu0 %v364_v6  ;;  %359 = vset.pattern.permute.xlu1 %v365_v7  ;;  %v176_v20 = vld [vmem:[%s525_s5 + $0x48] sm:$0xff]  ;;  %v175_v21 = vld [vmem:[%s525_s5 + $0x40] sm:$0xff]  ;;  %v174_v22 = vld [vmem:[%s525_s5 + $0x38] sm:$0xff]  ;;  %v64_v35 = vsub.s32 3, %v34_v28 }
   0x7   :  { %39 = vperm.xlu0 %357, %v26_v1   ;;  %59 = vperm.xlu1 %359, %v26_v1   ;;  %v173_v23 = vld [vmem:[%s525_s5 + $0x30] sm:$0xff]  ;;  %v172_v24 = vld [vmem:[%s525_s5 + $0x28] sm:$0xff]  ;;  %v171_v25 = vld [vmem:[%s525_s5 + $0x20] sm:$0xff] }
   0x8   :  { %299 = vmatpush3.msra.mxu0 %v83_v5  ;;  %316 = vmatpush3.msra.mxu1 %v182_v13  ;;  %v170_v26 = vld [vmem:[%s525_s5 + $0x18] sm:$0xff]  ;;  %v27_v31 = vld [vmem:[%s526_s1] sm:$0xf]  ;;  %v169_v52 = vld [vmem:[%s525_s5 + $0x10] sm:$0xff] }
   0x9   :  { %300 = vmatprep.subr.mxu0 %v363_v4  ;;  %317 = vmatprep.subr.mxu1 %v363_v4  ;;  %v36_v36 = vrot.slane %v27_v31, %v35_v29  ;;  %v45_v37 = vrot.slane %v27_v31, %v44_v30  ;;  %v55_v38 = vrot.slane %v27_v31, %v54_v33  ;;  %v266_v48 = vld [vmem:[%s527_s2] ss:$0 sm:$0xff]  ;;  %v168_v53 = vld [vmem:[%s525_s5 + $0x8] sm:$0xff] }
   0xa   :  { %301 = vmatpush3.msra.mxu0 %v82_v8  ;;  %318 = vmatpush3.msra.mxu1 %v181_v14  ;;  %v65_v39 = vrot.slane %v27_v31, %v64_v35  ;;  %v167_v54 = vld [vmem:[%s525_s5] sm:$0xff] }
   0xb   :  { %302 = vmatprep.subr.mxu0 %v363_v4  ;;  %360 = vset.pattern.permute.xlu0 %v365_v7  ;;  %v267_v55 = vld [vmem:[%s528_s4] ss:$0 sm:$0xff] }
   0xc   :  { %303 = vmatpush3.msra.mxu0 %v81_v9  ;;  %319 = vmatprep.subr.mxu1 %v363_v4  ;;  %v269_v60 = vld [vmem:[%s529_s6] ss:$0 sm:$0xff] }
   0xd   :  { %304 = vmatprep.subr.mxu0 %v363_v4  ;;  %320 = vmatpush3.msra.mxu1 %v180_v16 }
   0xe   :  { %305 = vmatpush3.msra.mxu0 %v80_v10  ;;  %321 = vmatprep.subr.mxu1 %v363_v4 }
   0xf   :  { %306 = vmatprep.subr.mxu0 %v363_v4  ;;  %322 = vmatpush3.msra.mxu1 %v179_v17 }
  0x10   :  { %307 = vmatpush3.msra.mxu0 %v79_v11  ;;  %323 = vmatprep.subr.mxu1 %v363_v4 }
  0x11   :  { %308 = vmatprep.subr.mxu0 %v363_v4  ;;  %324 = vmatpush3.msra.mxu1 %v178_v18 }
  0x12   :  { %309 = vmatpush3.msra.mxu0 %v78_v12  ;;  %325 = vmatprep.subr.mxu1 %v363_v4 }
  0x13   :  { %310 = vmatprep.subr.mxu0 %v363_v4  ;;  %326 = vmatpush3.msra.mxu1 %v177_v19 }
  0x14   :  { %311 = vmatpush3.msra.mxu0 %v77_v15  ;;  %327 = vmatprep.subr.mxu1 %v363_v4 }
  0x15   :  { %328 = vmatpush3.msra.mxu1 %v176_v20 }
  0x16   :  { %329 = vmatprep.subr.mxu1 %v363_v4 }
  0x17   :  { %330 = vmatpush3.msra.mxu1 %v175_v21 }
  0x18   :  { %331 = vmatprep.subr.mxu1 %v363_v4 }
  0x19   :  { %332 = vmatpush3.msra.mxu1 %v174_v22 }
  0x1a   :  { %333 = vmatprep.subr.mxu1 %v363_v4 }
  0x1b   :  { %334 = vmatpush3.msra.mxu1 %v173_v23 }
  0x1c   :  { %335 = vmatprep.subr.mxu1 %v363_v4 }
  0x1d   :  { %336 = vmatpush3.msra.mxu1 %v172_v24 }
  0x1e   :  { %337 = vmatprep.subr.mxu1 %v363_v4 }
  0x1f   :  { %338 = vmatpush3.msra.mxu1 %v171_v25 }
  0x20   :  { %339 = vmatprep.subr.mxu1 %v363_v4 }
  0x21   :  { %340 = vmatpush3.msra.mxu1 %v170_v26 }
  0x22   :  { %341 = vmatprep.subr.mxu1 %v363_v4 }
  0x23   :  { %342 = vmatpush3.msra.mxu1 %v169_v52 }
  0x24   :  { %343 = vmatprep.subr.mxu1 %v363_v4 }
  0x25   :  { %344 = vmatpush3.msra.mxu1 %v168_v53 }
  0x26   :  { %345 = vmatprep.subr.mxu1 %v363_v4 }
  0x27   :  { %346 = vmatpush3.msra.mxu1 %v167_v54 }
  0x7d   :  { %v31_v32 = vpop.permute.xlu0 %30  ;;  %v50_v34 = vpop.permute.xlu1 %49 }
  0x7e   :  { %v37_v42 = vmul.f32 %v36_v36, %v31_v32  ;;  %v56_v44 = vmul.f32 %v55_v38, %v50_v34 }
  0x82   :  { %v40_v40 = vpop.permute.xlu0 %39  ;;  %v60_v41 = vpop.permute.xlu1 %59 }
  0x83   :  { %v46_v43 = vmul.f32 %v45_v37, %v40_v40  ;;  %v66_v46 = vmul.f32 %v65_v39, %v60_v41 }
  0x85   :  { %v47_v45 = vadd.f32 %v46_v43, %v37_v42 }
  0x87   :  { %v57_v47 = vadd.f32 %v56_v44, %v47_v45 }
  0x89   :  { %v67_v49 = vadd.f32 %v66_v46, %v57_v47 }
  0x8b   :  { %v75_v50 = vadd.f32 %v266_v48, %v67_v49 }
  0x8d   :  { %v76_v51 = vmax.f32 %v75_v50, 0.0 }
  0x8f   :  { %313 = vmatmul.mubr.msk.f32.vlgmr.msra.gmra.mxu0 %vm92_vm1, %v76_v51 }
 0x14f   :  { %v162_v56 = vpop.f32.mrf.mxu0 }
 0x150   :  { %v163_v57 = vadd.f32 %v267_v55, %v162_v56 }
 0x151   :  { %v314_v58 = vpop.f32.mrf.mxu0 }
 0x152   :  { %v166_v59 = vmax.f32 %v163_v57, 0.0 }
 0x154   :  { %348 = vmatmul.mubr.f32.vlgmr.msra.gmra.mxu1 %v166_v59 }
 0x214   :  { %v256_v61 = vpop.f32.mrf.mxu1 }
 0x215   :  { %v257_v62 = vadd.f32 %v269_v60, %v256_v61 }
 0x216   :  { %v349_v63 = vpop.f32.mrf.mxu1 }
 0x217   :  { %v260_v0 = vmax.f32 %v257_v62, 0.0 }
 0x219   :  { %261 = vst [vmem:[%s530_s7] sm:$0xff] %v260_v0 }

</bundles_post_ra>
